<compile_context>
chip_gen: v5e
topology: v5e:2x2
jax: 0.10.0
libtpu: 0.0.40
codegen_flags: <defaults>
</compile_context>

<pallas_src>
import functools

import jax
import jax.numpy as jnp
from jax.experimental import pallas as pl
from jax.experimental.pallas import tpu as pltpu


# generation -> (per-input-buffer block byte budget, scoped vmem_limit_bytes)
_CHIP_TUNING = {
    "v7x": (12 * 1024 * 1024, 48 * 1024 * 1024),    # 64 MiB physical VMEM / TC
    "v6e": (8 * 1024 * 1024, 64 * 1024 * 1024),     # 128 MiB physical VMEM
    "v5e": (8 * 1024 * 1024, 64 * 1024 * 1024),     # 128 MiB physical VMEM
    "default": (4 * 1024 * 1024, 32 * 1024 * 1024),
}

_LANE = 128  # lane width: last-dim padding granularity in VMEM/HBM layouts


def _tpu_generation():
    try:
        kind = jax.devices()[0].device_kind.lower()
    except Exception:
        return "default"
    if "v7" in kind:
        return "v7x"
    if "v6" in kind:
        return "v6e"
    if "v5e" in kind or "v5 lite" in kind or "v5lite" in kind:
        return "v5e"
    return "default"


def _picked_sum_kernel(logp_ref, tgt_ref, part_ref, *, n_total, blocks_total,
                       row_blocks_per_part, guard_dup_blocks, mask_tail_rows):
    """Accumulate sum_n output[n, target[n]] for this part into part_ref."""
    p = pl.program_id(0)   # part (one per TensorCore on v7x; size 1 otherwise)
    i = pl.program_id(1)   # row-block within the part
    j = pl.program_id(2)   # class-block (usually 1)

    @pl.when((i == 0) & (j == 0))
    def _init():
        part_ref[...] = jnp.zeros_like(part_ref)

    # Global (unclamped) row-block index; used for duplicate-block skipping and
    # for the ragged-tail row mask.
    blk = p * row_blocks_per_part + i

    def _accumulate():
        logp = logp_ref[...].astype(jnp.float32)        # (tile_n, tile_c), upcast in-vreg
        tn, tc = logp.shape
        tgt = tgt_ref[...]                              # (tile_n, 1) int32 class ids
        if mask_tail_rows:
            # Fold row validity into the targets (sentinel -1): (tn,1)-sized
            # ops only, instead of masking the full (tn, tc) tile.
            rows = blk * tn + jax.lax.broadcasted_iota(jnp.int32, (tn, 1), 0)
            tgt = jnp.where(rows < n_total, tgt, -1)
        cls = j * tc + jax.lax.broadcasted_iota(jnp.int32, (tn, tc), 1)
        block_sum = jnp.sum(jnp.where(cls == tgt, logp, 0.0))
        part_ref[...] = part_ref[...] + block_sum       # scalar broadcast into (8,128)

    if guard_dup_blocks:
        # Uneven v7x half: the clamped duplicate block contributes nothing.
        pl.when(blk < blocks_total)(_accumulate)
    else:
        _accumulate()


def _picked_logprob_sum(output, tgt2d, *, num_parts, tile_n, tile_c,
                        vmem_limit, core_parallel):
    """Run the streaming kernel; returns sum_n output[n, target[n]] (f32 scalar)."""
    n, c = output.shape
    blocks_total = pl.cdiv(n, tile_n)
    class_blocks = pl.cdiv(c, tile_c)
    rbp = pl.cdiv(blocks_total, num_parts)              # row blocks per part

    if num_parts == 1:
        def row_map(p, i, j):
            return i                                    # identity, no clamp
    else:
        last = blocks_total - 1

        def row_map(p, i, j):
            # Clamp so an uneven part re-reads the last valid block (its
            # contribution is skipped in-kernel); keeps every DMA in bounds.
            return jnp.minimum(p * rbp + i, last)

    in_specs = [
        pl.BlockSpec((tile_n, tile_c), lambda p, i, j: (row_map(p, i, j), j)),
        pl.BlockSpec((tile_n, 1), lambda p, i, j: (row_map(p, i, j), 0)),
    ]
    out_specs = pl.BlockSpec((8, 128), lambda p, i, j: (p, 0))

    if core_parallel:
        semantics = (pltpu.CORE_PARALLEL, pltpu.ARBITRARY, pltpu.ARBITRARY)
    else:
        semantics = ("arbitrary", "arbitrary", "arbitrary")

    kernel = functools.partial(
        _picked_sum_kernel,
        n_total=n,
        blocks_total=blocks_total,
        row_blocks_per_part=rbp,
        guard_dup_blocks=(num_parts * rbp > blocks_total),
        mask_tail_rows=(n % tile_n != 0),
    )

    partials = pl.pallas_call(
        kernel,
        out_shape=jax.ShapeDtypeStruct((num_parts * 8, 128), jnp.float32),
        grid_spec=pltpu.PrefetchScalarGridSpec(
            num_scalar_prefetch=0,
            grid=(num_parts, rbp, class_blocks),
            in_specs=in_specs,
            out_specs=out_specs,
        ),
        compiler_params=pltpu.CompilerParams(
            dimension_semantics=semantics,
            vmem_limit_bytes=vmem_limit,
        ),
    )(output, tgt2d)

    return partials[0::8, 0].sum()                      # one partial per part


def weighted_classification_loss(output, target, weight, *, block_rows=None):
    """output: (N, C) log-probs (f32 or bf16); target: (N,) int; weight: (N,) float."""
    n, c = output.shape
    tgt2d = target.astype(jnp.int32).reshape(n, 1)

    gen = _tpu_generation()
    block_budget, vmem_limit = _CHIP_TUNING[gen]
    itemsize = jnp.dtype(output.dtype).itemsize

    # Lane-padded widths: last dim rounds up to 128 lanes in VMEM/HBM, and the
    # (N, 1) target stream pads to a full 128-lane row as well.
    tgt_row_bytes = _LANE * 4

    # Class-axis tiling guard (huge vocab): only tile C if even a 16-row stripe
    # of the full class axis would exceed the per-buffer budget.
    padded_c = -(-c // _LANE) * _LANE
    if 16 * (padded_c * itemsize + tgt_row_bytes) <= block_budget:
        tile_c = c                                       # common case: untiled
    else:
        tile_c = max(_LANE,
                     ((block_budget - 16 * tgt_row_bytes) // (16 * itemsize))
                     // _LANE * _LANE)

    # Row tiling: biggest multiple of 16 keeping one (tile_n, tile_c) log-prob
    # buffer + its target buffer within the per-buffer budget (x2 for the
    # double-buffered pipeline stays well inside vmem_limit).
    padded_tc = -(-tile_c // _LANE) * _LANE
    row_bytes = padded_tc * itemsize + tgt_row_bytes
    if block_rows is None:
        block_rows = max(16, (block_budget // row_bytes) // 16 * 16)
    else:
        block_rows = max(8, (int(block_rows) + 7) // 8 * 8)
    tile_n = n if n <= block_rows else int(block_rows)

    run = functools.partial(
        _picked_logprob_sum, output, tgt2d,
        tile_n=tile_n, tile_c=tile_c, vmem_limit=vmem_limit)

    if gen == "v7x":
        # Two partial sums, one per TensorCore: CORE_PARALLEL actually shards
        # the leading grid axis across both cores (plain "parallel" does not).
        try:
            picked = run(num_parts=2, core_parallel=True)
        except Exception:
            picked = run(num_parts=1, core_parallel=False)
    else:
        # Single-TC chips (v5e / v6e / unknown): one part, no clamping, one
        # accumulator block -- the 2-way split would be pure overhead.
        picked = run(num_parts=1, core_parallel=False)

    nll = -picked * (1.0 / n)                            # NLLLoss(reduction='mean')
    return nll * jnp.mean(weight.astype(jnp.float32))    # mean(loss*weight) == loss*mean(weight)


if __name__ == "__main__":
    key = jax.random.PRNGKey(0)
    k1, k2, k3 = jax.random.split(key, 3)

    # Small but ragged: 40 samples, 32 classes; force 16-row tiles so the
    # multi-block, masked-tail and (on v7x) uneven-half paths are exercised.
    N, C = 40, 32
    logits = jax.random.normal(k1, (N, C), dtype=jnp.float32)
    output = jax.nn.log_softmax(logits, axis=-1)
    target = jax.random.randint(k2, (N,), 0, C, dtype=jnp.int32)
    weight = jax.random.uniform(k3, (N,), dtype=jnp.float32) + 0.5

    loss = weighted_classification_loss(output, target, weight, block_rows=16)
    jax.block_until_ready(loss)

    # Pure-JAX reference of the same math.
    ref_nll = -jnp.mean(output[jnp.arange(N), target])
    ref = jnp.mean(ref_nll * weight)
    assert jnp.allclose(loss, ref, rtol=1e-5, atol=1e-6), (loss, ref)

    print("KERNEL_OK")
</pallas_src>

<mosaic_0001>
module attributes {stable_mosaic.version = 11 : i64} {
  func.func @_picked_sum_kernel(%arg0: i32, %arg1: i32, %arg2: i32, %arg3: memref<16x32xf32, #tpu.memory_space<vmem>>, %arg4: memref<16x1xi32, #tpu.memory_space<vmem>>, %arg5: memref<8x128xf32, #tpu.memory_space<vmem>>) attributes {dimension_semantics = [#tpu.dimension_semantics<arbitrary>, #tpu.dimension_semantics<arbitrary>, #tpu.dimension_semantics<arbitrary>], iteration_bounds = array<i64: 1, 3, 1>, scalar_prefetch = 0 : i64, scratch_operands = 0 : i64, tpu.core_type = #tpu.core_type<tc>, window_params = [{transform_indices = @transform_0, window_bounds = array<i64: 16, 32>}, {transform_indices = @transform_1, window_bounds = array<i64: 16, 1>}, {transform_indices = @transform_2, window_bounds = array<i64: 8, 128>}]} {
    %c0_i32 = arith.constant 0 : i32
    %0 = arith.cmpi eq, %arg1, %c0_i32 : i32
    %c0_i32_0 = arith.constant 0 : i32
    %1 = arith.cmpi eq, %arg2, %c0_i32_0 : i32
    %2 = arith.andi %0, %1 : i1
    %3 = arith.extui %2 : i1 to i32
    %c0_i32_1 = arith.constant 0 : i32
    %4 = arith.cmpi ne, %3, %c0_i32_1 : i32
    scf.if %4 {
      %cst_10 = arith.constant 0.000000e+00 : f32
      %33 = vector.broadcast %cst_10 : f32 to vector<8x128xf32>
      %c0_11 = arith.constant 0 : index
      %c0_12 = arith.constant 0 : index
      %34 = vector.load %arg5[%c0_11, %c0_12] : memref<8x128xf32, #tpu.memory_space<vmem>>, vector<8x128xf32>
      tpu.vector_store %arg5[%c0_11, %c0_12], %33 {strides = array<i32>} : memref<8x128xf32, #tpu.memory_space<vmem>>, vector<8x128xf32>,
    } else {
    }
    %c3_i32 = arith.constant 3 : i32
    %5 = arith.muli %arg0, %c3_i32 : i32
    %6 = arith.addi %5, %arg1 : i32
    %c0 = arith.constant 0 : index
    %c0_2 = arith.constant 0 : index
    %7 = vector.load %arg3[%c0, %c0_2] : memref<16x32xf32, #tpu.memory_space<vmem>>, vector<16x32xf32>
    %c0_3 = arith.constant 0 : index
    %c0_4 = arith.constant 0 : index
    %8 = vector.load %arg4[%c0_3, %c0_4] : memref<16x1xi32, #tpu.memory_space<vmem>>, vector<16x1xi32>
    %c16_i32 = arith.constant 16 : i32
    %9 = arith.muli %6, %c16_i32 : i32
    %10 = tpu.iota {dimensions = array<i32: 0>} : vector<16x1xi32>
    %11 = vector.broadcast %9 : i32 to vector<16x1xi32>
    %12 = arith.addi %11, %10 : vector<16x1xi32>
    %c40_i32 = arith.constant 40 : i32
    %13 = vector.broadcast %c40_i32 : i32 to vector<16x1xi32>
    %14 = arith.cmpi slt, %12, %13 : vector<16x1xi32>
    %c-1_i32 = arith.constant -1 : i32
    %15 = vector.broadcast %c-1_i32 : i32 to vector<16x1xi32>
    %16 = arith.select %14, %8, %15 : vector<16x1xi1>, vector<16x1xi32>
    %c32_i32 = arith.constant 32 : i32
    %17 = arith.muli %arg2, %c32_i32 : i32
    %18 = tpu.iota {dimensions = array<i32: 1>} : vector<16x32xi32>
    %19 = vector.broadcast %17 : i32 to vector<16x32xi32>
    %20 = arith.addi %19, %18 : vector<16x32xi32>
    %21 = vector.broadcast %16 : vector<16x1xi32> to vector<16x32xi32>
    %22 = arith.cmpi eq, %20, %21 : vector<16x32xi32>
    %cst = arith.constant 0.000000e+00 : f32
    %23 = vector.broadcast %cst : f32 to vector<16x32xf32>
    %24 = arith.select %22, %7, %23 : vector<16x32xi1>, vector<16x32xf32>
    %25 = vector.shape_cast %24 : vector<16x32xf32> to vector<1x16x32xf32>
    %cst_5 = arith.constant dense<0.000000e+00> : vector<1xf32>
    %26 = vector.multi_reduction <add>, %25, %cst_5 [1, 2] : vector<1x16x32xf32> to vector<1xf32>
    %27 = vector.shape_cast %26 : vector<1xf32> to vector<1x1x1xf32>
    %28 = vector.extract %27[0, 0, 0] : f32 from vector<1x1x1xf32>
    %c0_6 = arith.constant 0 : index
    %c0_7 = arith.constant 0 : index
    %29 = vector.load %arg5[%c0_6, %c0_7] : memref<8x128xf32, #tpu.memory_space<vmem>>, vector<8x128xf32>
    %30 = vector.broadcast %28 : f32 to vector<8x128xf32>
    %31 = arith.addf %29, %30 : vector<8x128xf32>
    %c0_8 = arith.constant 0 : index
    %c0_9 = arith.constant 0 : index
    %32 = vector.load %arg5[%c0_8, %c0_9] : memref<8x128xf32, #tpu.memory_space<vmem>>, vector<8x128xf32>
    tpu.vector_store %arg5[%c0_8, %c0_9], %31 {strides = array<i32>} : memref<8x128xf32, #tpu.memory_space<vmem>>, vector<8x128xf32>,
    return
  }
  func.func @transform_0(%arg0: i32, %arg1: i32, %arg2: i32) -> (i32, i32) {
    %c0_i32 = arith.constant 0 : i32
    return %arg1, %arg2 : i32, i32
  }
  func.func @transform_1(%arg0: i32, %arg1: i32, %arg2: i32) -> (i32, i32) {
    %c0_i32 = arith.constant 0 : i32
    %c0_i32_0 = arith.constant 0 : i32
    return %arg1, %c0_i32 : i32, i32
  }
  func.func @transform_2(%arg0: i32, %arg1: i32, %arg2: i32) -> (i32, i32) {
    %c0_i32 = arith.constant 0 : i32
    %c0_i32_0 = arith.constant 0 : i32
    return %arg0, %c0_i32 : i32, i32
  }
}

</mosaic_0001>

<bundles_post_ra>
// kernel: tpu_custom_call.1
= control target key start
LH: loop header
LB: loop body
LE: loop exit
PB: predicated region body
PF: predicated region fallthrough
CT: control target
= control target key end

     0   :  { %7 = vsyncpa [#allocation3], 0  ;;  %s489_s9 = smov 0   ;;  %s491_s10 = smov 0   ;;  %s528_s0 = inlined_call_operand.vmem [shape: f32[40,32], index: 0, kind: input, shape index: {}]   ;;  %s529_s1 = inlined_call_operand.vmem [shape: s32[40,1], index: 1, kind: input, shape index: {}]   ;;  %s530_s2 = inlined_call_operand.hbm [shape: f32[8,128], index: 2, kind: output, shape index: {}]  }
   0x1   :  { %s493_s11 = smov 0  }
   0x2 LB: > { %s364_s12 = sadd.s32 4294967295, %s469_s11   ;;  %s28_s13 = sadd.s32 1, %s465_s10  ;;  %s469_s11 = sphi %s493_s11, %s13_s11   ;;  %s465_s10 = sphi %s491_s10, %s532_s10   ;;  %s461_s9 = sphi %s489_s9, %s531_s9  }
   0x3   : > { %p30_p0 = scmp.ge.s32.totalorder %s28_s13, 3  ;;  %p367_p1 = scmp.ge.s32.totalorder %s469_s11, 1 }
   0x4   : > { %p165_p2 = scmp.lt.s32.totalorder %s469_s11, 4 }
   0x5   : > { %s534_s13 = smov (%p30_p0, %s28_s13), 0 }
   0x6   : > { %p166_p3 = pnand %p367_p1, %p165_p2 }
   0x7   : > { %s368_s14 = sshll.u32 (!%p166_p3), %s461_s9, 1  ;;  %p229_p4 = scmp.eq.s32.totalorder (!%p166_p3), %s461_s9, 0 }
   0x8   : > { %169 = sbr.rel (%p166_p3) target bundleno = 339 (0x153), region = 28  ;;  %p203_p5 = scmp.lt.s32.totalorder (!%p166_p3), %s368_s14, 4 }
   0xd   : > { %s536_s14 = smov (!%p203_p5, %s368_s14), 4  ;;  %234 = sbr.rel (!%p229_p4) target bundleno = 18 (0x12), region = 32  ;;  %v471_v0 = vmov (%p229_p4), 0.0  }
   0xe   : > { %s369_s15 = sshll.u32 %s536_s14, 3  ;;  %235 = vst [vmem:[#allocation2] sm:$0xff] (%p229_p4), %v471_v0 }
   0xf   : > { %s209_s18 = scalar_lea.vmem %s528_s0, %s369_s15  ;;  %s223_s21 = scalar_lea.vmem %s529_s1, %s369_s15 }
  0x12 PF: > { %s373_s22 = sshll.u32 %s461_s9, 4  ;;  %v243_v1 = vlaneseq  ;;  %v472_v2 = vmov 0   ;;  %v240_v5 = vld [vmem:[%s223_s21] sm:$0xff]  ;;  %v241_v10 = vld [vmem:[%s223_s21 + $0x8] sm:$0xff]  ;;  %vm268_vm3 = vcmask 261120   ;;  %s473_s23 = smov [#allocation2]  }
  0x13   : > { %414 = vset.pattern.permute.xlu0 %v472_v2  ;;  %v246_v3 = vstv %s373_s22  ;;  %v238_v14 = vld [vmem:[%s209_s18] sm:$0xff]  ;;  %v239_v15 = vld [vmem:[%s209_s18 + $0x8] sm:$0xff]  ;;  %s293_s24 = sshll.u32 %s473_s23, 4  ;;  %s295_s27 = sshll.u32 %s530_s2, 4  ;;  %s294_s24 = int_to_ptr.vmem [resolvable:$true] %s293_s24  ;;  %s296_s27 = int_to_ptr.hbm [resolvable:$true] %s295_s27 }
  0x14   : > { %v244_v4 = vshrl.u32 %v243_v1, 7  ;;  %v255_v13 = vand.u32 127, %v243_v1  ;;  %p385_p6 = scmp.eq.s32.totalorder %s364_s12, 2 }
  0x15   : > { %v281_v29 = vld [vmem:[#allocation2] sm:$0xff] }
  0x16   : > { %v247_v6 = vadd.s32 %v246_v3, %v244_v4  ;;  %v245_v7 = vadd.s32 8, %v244_v4 }
  0x18   : > { %vm249_vm0 = vcmp.lt.s32.totalorder %v247_v6, 40  ;;  %v248_v8 = vadd.s32 %v246_v3, %v245_v7 }
  0x19   : > { %v251_v9 = vsel %vm249_vm0, %v240_v5, 4294967295 }
  0x1a   : > { %259 = vperm.xlu0 %414, %v251_v9   ;;  %vm250_vm1 = vcmp.lt.s32.totalorder %v248_v8, 40 }
  0x1b   : > { %v252_v11 = vsel %vm250_vm1, %v241_v10, 4294967295 }
  0x22   : > { %262 = vperm.xlu0 %414, %v252_v11  }
  0x8c   : > { %v260_v12 = vpop.permute.xlu0 %259 }
  0x8d   : > { %vm264_vm2 = vcmp.eq.s32.totalorder %v255_v13, %v260_v12 }
  0x8e   : > { %v266_v16 = vsel %vm264_vm2, %v238_v14, 0.0 }
  0x8f   : > { %v269_v19 = vsel %vm268_vm3, %v266_v16, 0.0 }
  0x94   : > { %v263_v17 = vpop.permute.xlu0 %262 }
  0x95   : > { %vm265_vm4 = vcmp.eq.s32.totalorder %v255_v13, %v263_v17 }
  0x96   : > { %v267_v18 = vsel %vm265_vm4, %v239_v15, 0.0 }
  0x97   : > { %v270_v20 = vsel %vm268_vm3, %v267_v18, 0.0 }
  0x98   : > { %v271_v21 = vadd.f32 %v270_v20, %v269_v19 }
  0x9a   : > { %272 = vadd.xlane.f32.xlu1 %v271_v21 }
 0x10d   : > { %v273_v22 = vpop.xlane.xlu1 %272 }
 0x10e   : > { %v274_v23 = vrot.slane %v273_v22, 4 }
 0x110   : > { %v275_v24 = vadd.f32 %v274_v23, %v273_v22 }
 0x112   : > { %v276_v25 = vrot.slane %v275_v24, 2 }
 0x114   : > { %v277_v26 = vadd.f32 %v276_v25, %v275_v24 }
 0x116   : > { %v278_v27 = vrot.slane %v277_v26, 1 }
 0x118   : > { %v279_v28 = vadd.f32 %v278_v27, %v277_v26 }
 0x11a   : > { %379 = vpush %v279_v28 }
 0x14b   : > { %s380_s28 = spop %379 }
 0x14c   : > { %v282_v30 = vstv %s380_s28 }
 0x14d   : > { %v283_v31 = vadd.f32 %v282_v30, %v281_v29 }
 0x14f   : > { %284 = vst [vmem:[#allocation2] sm:$0xff] %v283_v31 }
 0x150   : > { %382 = dma.vmem_to_hbm [thread:$0]  (%p385_p6), %s294_s24, 128, %s296_s27, [#allocation3]  }
 0x151   : > { %456 = dma.done.wait (%p385_p6), [#allocation3], 128  }
 0x152   : > { %458 = vsyncadd (%p385_p6), [#allocation3], 4294967168 }
 0x153 PF: > { %s13_s11 = sadd.s32 1, %s469_s11   ;;  %s531_s9 = smov %s465_s10 }
 0x154   : > { %p10_p7 = scmp.ge.s32.totalorder %s13_s11, 5   ;;  %s532_s10 = smov %s534_s13 }
 0x156   :  { %12 = sbr.rel (!%p10_p7) target bundleno = 2 (0x2), region = 63 }
 0x15b   :  { %309 = vsyncpa [#allocation3], 1 }
 0x15c   :  { %311 = vsyncpa [#allocation3 + $0x1], 1 }

</bundles_post_ra>
